<compile_context>
chip_gen: v7x
topology: tpu7x:2x2x1
jax: 0.10.0
libtpu: 0.0.40
codegen_flags: <defaults>
</compile_context>

<pallas_src>
import jax
import jax.numpy as jnp
from jax import lax
from jax.experimental import pallas as pl
from jax.experimental.pallas import tpu as pltpu


def _relu_conv1x1_sigmoid_kernel(x_ref, w_ref, b_ref, o_ref):
    # x_ref: (tile_m, Cin)  rows = pixels
    # w_ref: (Cin, Cout)    pre-transposed conv weight (K, N orientation)
    # b_ref: (1, Cout)
    x = jnp.maximum(x_ref[...], 0.0)                         # ReLU
    y = lax.dot_general(                                     # 1x1 conv == x @ w
        x, w_ref[...],
        dimension_numbers=(((1,), (0,)), ((), ())),
        preferred_element_type=jnp.float32,
        precision=lax.Precision.HIGHEST,
    )
    y = y + b_ref[...]                                       # conv bias
    o_ref[...] = jax.nn.sigmoid(y).astype(o_ref.dtype)       # Sigmoid


def prepare_params(weight, bias):
    """One-time parameter prep (do this when weights are loaded, not per call).

    weight: (Cout, Cin, 1, 1) PyTorch-layout conv weight
    bias:   (Cout,)
    Returns (w_mat (Cin, Cout), b_row (1, Cout)).
    """
    Cout, Cin = weight.shape[0], weight.shape[1]
    w_mat = jnp.asarray(weight).reshape(Cout, Cin).T          # (Cin, Cout)
    b_row = jnp.asarray(bias).reshape(1, Cout)
    return w_mat, b_row


def relu_conv1x1_sigmoid(x_nchw, w_mat, b_row, *, tile_m=1024, no_grid_max_m=256):
    """x_nchw: (N, Cin, H, W); w_mat: (Cin, Cout); b_row: (1, Cout)."""
    N, Cin, H, W = x_nchw.shape
    Cout = w_mat.shape[1]
    M = N * H * W

    # NCHW -> (M, Cin). For H == W == 1 this is a pure reshape (no transpose).
    if H == 1 and W == 1:
        x_rows = x_nchw.reshape(M, Cin)
    else:
        # TODO(synk): fold this layout change into the kernel BlockSpec for H*W>1.
        x_rows = jnp.transpose(x_nchw, (0, 2, 3, 1)).reshape(M, Cin)

    if M <= no_grid_max_m:
        # Small-M path (this module: M = 1): single invocation, no grid,
        # whole arrays resident in VMEM, no pipeline overhead, no padding,
        # no surrounding XLA pad/slice ops.
        out_rows = pl.pallas_call(
            _relu_conv1x1_sigmoid_kernel,
            out_shape=jax.ShapeDtypeStruct((M, Cout), x_rows.dtype),
            in_specs=[
                pl.BlockSpec(memory_space=pltpu.MemorySpace.VMEM),
                pl.BlockSpec(memory_space=pltpu.MemorySpace.VMEM),
                pl.BlockSpec(memory_space=pltpu.MemorySpace.VMEM),
            ],
            out_specs=pl.BlockSpec(memory_space=pltpu.MemorySpace.VMEM),
        )(x_rows, w_mat, b_row)
    else:
        # Large-M path: 1-D grid over row tiles; weight/bias stay resident
        # (constant index_map). Ragged last block is masked by Pallas, so no
        # wrapper-side pad or slice (no extra HBM passes).
        tm = max(8, (tile_m // 8) * 8)
        out_rows = pl.pallas_call(
            _relu_conv1x1_sigmoid_kernel,
            out_shape=jax.ShapeDtypeStruct((M, Cout), x_rows.dtype),
            grid=(pl.cdiv(M, tm),),
            in_specs=[
                pl.BlockSpec((tm, Cin), lambda i: (i, 0)),
                pl.BlockSpec((Cin, Cout), lambda i: (0, 0)),
                pl.BlockSpec((1, Cout), lambda i: (0, 0)),
            ],
            out_specs=pl.BlockSpec((tm, Cout), lambda i: (i, 0)),
            compiler_params=pltpu.CompilerParams(
                dimension_semantics=("parallel",)),
        )(x_rows, w_mat, b_row)

    # (M, Cout) -> NCHW
    if H == 1 and W == 1:
        return out_rows.reshape(N, Cout, 1, 1)
    return out_rows.reshape(N, H, W, Cout).transpose(0, 3, 1, 2)


def _reference(x_nchw, weight, bias):
    Cout, Cin = weight.shape[0], weight.shape[1]
    return jax.nn.sigmoid(
        jnp.einsum("nchw,oc->nohw", jnp.maximum(x_nchw, 0.0),
                   weight.reshape(Cout, Cin))
        + bias.reshape(1, Cout, 1, 1)
    )


if __name__ == "__main__":
    key = jax.random.PRNGKey(0)
    kx, kw, kb, kx2 = jax.random.split(key, 4)

    # Shapes implied by the module: x79 = randn([1, 54, 1, 1]); Conv2d(54, 216, 1x1)
    N, Cin, H, W = 1, 54, 1, 1
    Cout = 216

    x = jax.random.normal(kx, (N, Cin, H, W), dtype=jnp.float32)
    bound = 1.0 / (Cin ** 0.5)
    weight = jax.random.uniform(kw, (Cout, Cin, 1, 1), dtype=jnp.float32,
                                minval=-bound, maxval=bound)
    bias = jax.random.uniform(kb, (Cout,), dtype=jnp.float32,
                              minval=-bound, maxval=bound)

    # One-time parameter prep (outside the per-call path).
    w_mat, b_row = prepare_params(weight, bias)
    w_mat, b_row = jax.block_until_ready((w_mat, b_row))

    # Module-shaped case (M = 1, no-grid path).
    out = relu_conv1x1_sigmoid(x, w_mat, b_row)
    jax.block_until_ready(out)
    assert out.shape == (N, Cout, H, W), out.shape
    ref = _reference(x, weight, bias)
    assert jnp.allclose(out, ref, atol=1e-5, rtol=1e-5)

    # Exercise the gridded path (ragged last block) at a small size.
    N2 = 300  # M = 300, tile_m = 128 -> grid 3 with a masked 44-row tail
    x2 = jax.random.normal(kx2, (N2, Cin, 1, 1), dtype=jnp.float32)
    out2 = relu_conv1x1_sigmoid(x2, w_mat, b_row, tile_m=128)
    jax.block_until_ready(out2)
    ref2 = _reference(x2, weight, bias)
    assert out2.shape == (N2, Cout, 1, 1), out2.shape
    assert jnp.allclose(out2, ref2, atol=1e-5, rtol=1e-5)

    print("KERNEL_OK")
</pallas_src>

<mosaic_0001>
module attributes {stable_mosaic.version = 11 : i64} {
  func.func @_relu_conv1x1_sigmoid_kernel(%arg0: memref<1x54xf32, #tpu.memory_space<vmem>>, %arg1: memref<54x216xf32, #tpu.memory_space<vmem>>, %arg2: memref<1x216xf32, #tpu.memory_space<vmem>>, %arg3: memref<1x216xf32, #tpu.memory_space<vmem>>) attributes {dimension_semantics = [], scalar_prefetch = 0 : i64, scratch_operands = 0 : i64, tpu.core_type = #tpu.core_type<tc>} {
    %c0 = arith.constant 0 : index
    %c0_0 = arith.constant 0 : index
    %0 = vector.load %arg0[%c0, %c0_0] : memref<1x54xf32, #tpu.memory_space<vmem>>, vector<1x54xf32>
    %cst = arith.constant 0.000000e+00 : f32
    %1 = vector.broadcast %cst : f32 to vector<1x54xf32>
    %2 = arith.maximumf %0, %1 : vector<1x54xf32>
    %c0_1 = arith.constant 0 : index
    %c0_2 = arith.constant 0 : index
    %3 = vector.load %arg1[%c0_1, %c0_2] : memref<54x216xf32, #tpu.memory_space<vmem>>, vector<54x216xf32>
    %cst_3 = arith.constant dense<0.000000e+00> : vector<1x216xf32>
    %4 = tpu.matmul %2, %3, %cst_3 {dimension_numbers = #tpu.dot_dimension_numbers<[1], [0], [0], [1], [0, 0, 1, 1], [], []>, precision = #tpu.contract_precision<fp32>} : vector<1x54xf32>, vector<54x216xf32>, vector<1x216xf32> -> vector<1x216xf32>
    %c0_4 = arith.constant 0 : index
    %c0_5 = arith.constant 0 : index
    %5 = vector.load %arg2[%c0_4, %c0_5] : memref<1x216xf32, #tpu.memory_space<vmem>>, vector<1x216xf32>
    %6 = arith.addf %4, %5 : vector<1x216xf32>
    %7 = arith.negf %6 : vector<1x216xf32>
    %8 = math.exp %7 : vector<1x216xf32>
    %cst_6 = arith.constant 1.000000e+00 : f32
    %9 = vector.broadcast %cst_6 : f32 to vector<1x216xf32>
    %10 = arith.addf %9, %8 : vector<1x216xf32>
    %11 = arith.divf %9, %10 : vector<1x216xf32>
    %c0_7 = arith.constant 0 : index
    %c0_8 = arith.constant 0 : index
    %12 = vector.load %arg3[%c0_7, %c0_8] : memref<1x216xf32, #tpu.memory_space<vmem>>, vector<1x216xf32>
    tpu.vector_store %arg3[%c0_7, %c0_8], %11 {strides = array<i32>} : memref<1x216xf32, #tpu.memory_space<vmem>>, vector<1x216xf32>,
    return
  }
}

</mosaic_0001>

<bundles_post_ra>
// kernel: tpu_custom_call.1
= control target key start
LH: loop header
LB: loop body
LE: loop exit
PB: predicated region body
PF: predicated region fallthrough
CT: control target
= control target key end

     0   :  { %8 = vsyncpa [#allocation3], 0  ;;  %s1129_s0 = inlined_call_operand.hbm [shape: f32[1,54], index: 0, kind: input, shape index: {}]   ;;  %s1130_s1 = inlined_call_operand.hbm [shape: f32[54,216], index: 1, kind: input, shape index: {}]   ;;  %s1131_s2 = inlined_call_operand.vmem [shape: f32[1,216], index: 2, kind: input, shape index: {}]   ;;  %s1132_s3 = inlined_call_operand.hbm [shape: f32[1,216], index: 3, kind: output, shape index: {}]  }
   0x1   :  { %9 = vsyncpa [#allocation6], 0 }
   0x2   :  { %10 = vsyncpa [#allocation4], 0  ;;  %s925_s12 = smov [#allocation2]   ;;  %s926_s14 = smov [#allocation5]  }
   0x3   :  { %s17_s13 = sshll.u32 %s925_s12, 4  ;;  %s26_s15 = sshll.u32 %s926_s14, 4  ;;  %s18_s13 = int_to_ptr.vmem [resolvable:$true] %s17_s13  ;;  %s952_s15 = int_to_ptr.vmem [resolvable:$true] %s26_s15 }
   0x4   :  { %s853_s18 = scalar_lea.hbm %s1129_s0, 16 }
   0x5   :  { %p854_p0 = scmp.ne.s32.totalorder %s1129_s0, %s853_s18  ;;  %p857_p1 = scmp.lt.u32.totalorder %s853_s18, %s1129_s0 }
   0x7   :  { %p859_p2 = pnand %p857_p1, %p854_p0 }
   0x9   :  { %862 = shalt.err (!%p859_p2)
}
   0xa   :  { %s863_s23 = scalar_lea.vmem %s18_s13, 16  ;;  %s867_s24 = scalar_lea.vmem %s18_s13, 32 }
   0xb   :  { %p864_p3 = scmp.ne.s32.totalorder %s18_s13, %s863_s23  ;;  %p868_p4 = scmp.lt.s32.totalorder %s18_s13, %s18_s13 }
   0xc   :  { %p869_p5 = scmp.lt.s32.totalorder %s867_s24, %s863_s23 }
   0xe   :  { %p870_p6 = por %p869_p5, %p868_p4 }
  0x10   :  { %p871_p7 = pnand %p870_p6, %p864_p3 }
  0x12   :  { %874 = shalt.err (!%p871_p7)
}
  0x13   :  { %20 = dma.hbm_to_vmem [thread:$0]  %s1129_s0, 16, %s18_s13, [#allocation3]  }
  0x14   :  { %s875_s29 = scalar_lea.hbm %s1130_s1, 1792 }
  0x15   :  { %p876_p8 = scmp.ne.s32.totalorder %s1130_s1, %s875_s29  ;;  %p879_p9 = scmp.lt.u32.totalorder %s875_s29, %s1130_s1 }
  0x17   :  { %p881_p10 = pnand %p879_p9, %p876_p8 }
  0x19   :  { %884 = shalt.err (!%p881_p10)
}
  0x1a   :  { %s885_s7 = scalar_lea.vmem %s952_s15, 1792  ;;  %p890_p12 = scmp.lt.s32.totalorder %s952_s15, %s952_s15 }
  0x1b   :  { %p886_p11 = scmp.ne.s32.totalorder %s952_s15, %s885_s7  ;;  %p891_p13 = scmp.lt.s32.totalorder %s885_s7, %s885_s7 }
  0x1d   :  { %p892_p0 = por %p891_p13, %p890_p12 }
  0x1f   :  { %p893_p1 = pnand %p892_p0, %p886_p11 }
  0x21   :  { %896 = shalt.err (!%p893_p1)
}
  0x22   :  { %s927_s0 = smov 256   ;;  %s928_s8 = smov 16  }
  0x23   :  { %32 = dma.hbm_to_vmem [thread:$0]  %s1130_s1, 1792, %s952_s15, [#allocation6], %s927_s0, %s927_s0, %s928_s8  }
  0x24   :  { %919 = dma.done.wait [#allocation3], 16  }
  0x25   :  { %920 = vsyncadd [#allocation3], 4294967280 }
  0x26   :  { %921 = dma.done.wait [#allocation6], 1792  }
  0x27   :  { %922 = vsyncadd [#allocation6], 4294965504  ;;  %v929_v0 = vmov 0.0   ;;  %v44_v1 = vld [vmem:[#allocation5 + $0x8] sm:$0xff]  ;;  %v46_v2 = vld [vmem:[#allocation5 + $0x18] sm:$0xff]  ;;  %vm73_vm0 = vcmask 1045504  }
  0x28   :  { %158 = vmatprep.mubr.f32.mxu1 %v929_v0  ;;  %491 = vmatprep.mubr.f32.mxu0 %v929_v0  ;;  %v43_v3 = vld [vmem:[#allocation5] sm:$0xff]  ;;  %v80_v4 = vand.u32 4294901760, %v44_v1  ;;  %v84_v5 = vand.u32 4294901760, %v46_v2  ;;  %v45_v6 = vld [vmem:[#allocation5 + $0x10] sm:$0xff]  ;;  %v48_v8 = vld [vmem:[#allocation5 + $0x28] sm:$0xff]  ;;  %vm69_vm1 = vcmask 441344  }
  0x29   :  { %v82_v7 = vand.u32 4294901760, %v43_v3  ;;  %v50_v9 = vld [vmem:[#allocation5 + $0x38] sm:$0xff]  ;;  %v86_v10 = vand.u32 4294901760, %v45_v6  ;;  %v88_v11 = vand.u32 4294901760, %v48_v8  ;;  %v47_v13 = vld [vmem:[#allocation5 + $0x20] sm:$0xff]  ;;  %v49_v14 = vld [vmem:[#allocation5 + $0x30] sm:$0xff] }
  0x2a   :  { %v92_v12 = vand.u32 4294901760, %v50_v9  ;;  %v52_v15 = vld [vmem:[#allocation5 + $0x48] sm:$0xff]  ;;  %v985_v16 = vpack.c.bf16 %v84_v5, %v80_v4  ;;  %v987_v17 = vsub.f32 %v44_v1, %v80_v4  ;;  %v989_v18 = vsub.f32 %v46_v2, %v84_v5  ;;  %v54_v20 = vld [vmem:[#allocation5 + $0x58] sm:$0xff]  ;;  %v51_v21 = vld [vmem:[#allocation5 + $0x40] sm:$0xff] }
  0x2b   :  { %v991_v19 = vsub.f32 %v43_v3, %v82_v7  ;;  %v53_v22 = vld [vmem:[#allocation5 + $0x50] sm:$0xff]  ;;  %v993_v23 = vpack.c.bf16 %v86_v10, %v82_v7  ;;  %v995_v24 = vsub.f32 %v45_v6, %v86_v10  ;;  %v999_v26 = vsub.f32 %v48_v8, %v88_v11  ;;  %v56_v27 = vld [vmem:[#allocation5 + $0x68] sm:$0x3f]  ;;  %v55_v36 = vld [vmem:[#allocation5 + $0x60] sm:$0x3f] }
  0x2c   :  { %v997_v25 = vpack.c.bf16 %v92_v12, %v88_v11  ;;  %755 = vmatprep.subr.bf16.mxu1 %v985_v16  ;;  %791 = vmatprep.subr.bf16.mxu0 %v985_v16  ;;  %v1003_v28 = vsub.f32 %v50_v9, %v92_v12  ;;  %v90_v29 = vand.u32 4294901760, %v47_v13  ;;  %v94_v30 = vand.u32 4294901760, %v49_v14  ;;  %v41_v40 = vld [vmem:[#allocation2] sm:$0x1] }
  0x2d   :  { %v96_v31 = vand.u32 4294901760, %v52_v15  ;;  %757 = vmatpush1.bf16.msra.mxu1 %v993_v23  ;;  %793 = vmatpush1.bf16.msra.mxu0 %v993_v23  ;;  %v100_v32 = vand.u32 4294901760, %v54_v20  ;;  %v98_v33 = vand.u32 4294901760, %v51_v21  ;;  %v102_v34 = vand.u32 4294901760, %v53_v22 }
  0x2e   :  { %v1008_v35 = vsel %vm73_vm0, %v56_v27, 0  ;;  %759 = vmatprep.subr.bf16.mxu1 %v997_v25  ;;  %795 = vmatprep.subr.bf16.mxu0 %v997_v25  ;;  %v1012_v37 = vpack.c.bf16 %v94_v30, %v90_v29  ;;  %v1014_v38 = vsub.f32 %v47_v13, %v90_v29  ;;  %v1016_v39 = vsub.f32 %v49_v14, %v94_v30 }
  0x2f   :  { %v1018_v41 = vpack.c.bf16 %v100_v32, %v96_v31  ;;  %v1020_v42 = vsub.f32 %v52_v15, %v96_v31  ;;  %v1022_v43 = vsub.f32 %v54_v20, %v100_v32  ;;  %v1025_v44 = vand.u32 4294901760, %v1008_v35 }
  0x30   :  { %v1027_v45 = vpack.c.bf16 %v102_v34, %v98_v33  ;;  %v1029_v46 = vsub.f32 %v51_v21, %v98_v33  ;;  %v75_v47 = vsel %vm73_vm0, %v55_v36, 0  ;;  %v172_v48 = vand.u32 4294901760, %v987_v17 }
  0x31   :  { %761 = vmatpush1.bf16.msra.mxu1 %v1012_v37  ;;  %797 = vmatpush1.bf16.msra.mxu0 %v1012_v37  ;;  %v1035_v49 = vand.u32 4294901760, %v75_v47  ;;  %v184_v50 = vand.u32 4294901760, %v989_v18  ;;  %v42_v51 = vmax.f32 %v41_v40, 0.0  ;;  %v178_v52 = vand.u32 4294901760, %v991_v19 }
  0x32   :  { %763 = vmatprep.subr.bf16.mxu1 %v1018_v41  ;;  %799 = vmatprep.subr.bf16.mxu0 %v1018_v41  ;;  %v173_v53 = vsub.f32 %v987_v17, %v172_v48  ;;  %v190_v54 = vand.u32 4294901760, %v995_v24  ;;  %v196_v55 = vand.u32 4294901760, %v999_v26  ;;  %v208_v56 = vand.u32 4294901760, %v1003_v28 }
  0x33   :  { %v1045_v57 = vsub.f32 %v53_v22, %v102_v34  ;;  %v1048_v58 = vsub.f32 %v75_v47, %v1035_v49  ;;  %v185_v59 = vsub.f32 %v989_v18, %v184_v50  ;;  %v71_v60 = vsel %vm69_vm1, %v42_v51, 0 }
  0x34   :  { %v174_v61 = vand.u32 4294901760, %v173_v53  ;;  %v1052_v62 = vand.u32 4294901760, %v71_v60  ;;  %v179_v63 = vsub.f32 %v991_v19, %v178_v52  ;;  %v191_v1 = vsub.f32 %v995_v24, %v190_v54 }
  0x35   :  { %765 = vmatpush1.bf16.msra.mxu1 %v1027_v45  ;;  %801 = vmatpush1.bf16.msra.mxu0 %v1027_v45  ;;  %v186_v2 = vand.u32 4294901760, %v185_v59  ;;  %v802_v3 = vpack.c.bf16 %v184_v50, %v172_v48  ;;  %v197_v4 = vsub.f32 %v999_v26, %v196_v55  ;;  %v209_v5 = vsub.f32 %v1003_v28, %v208_v56 }
  0x36   :  { %105 = vmatprep.subr.mxu1 %v1025_v44  ;;  %438 = vmatprep.subr.mxu0 %v1025_v44  ;;  %v1063_v6 = vsub.f32 %v71_v60, %v1052_v62  ;;  %v180_v7 = vand.u32 4294901760, %v179_v63  ;;  %v192_v8 = vand.u32 4294901760, %v191_v1  ;;  %v804_v9 = vpack.c.bf16 %v190_v54, %v178_v52 }
  0x37   :  { %v766_v10 = vpack.c.bf16 %v186_v2, %v174_v61  ;;  %v198_v11 = vand.u32 4294901760, %v197_v4  ;;  %v210_v12 = vand.u32 4294901760, %v209_v5  ;;  %v202_v13 = vand.u32 4294901760, %v1014_v38 }
  0x38   :  { %v161_v14 = vand.u32 4294901760, %v1063_v6  ;;  %v806_v15 = vpack.c.bf16 %v208_v56, %v196_v55  ;;  %v214_v20 = vand.u32 4294901760, %v1016_v39  ;;  %v220_v21 = vand.u32 4294901760, %v1020_v42 }
  0x39   :  { %107 = vmatpush1.msra.mxu1 %v1035_v49  ;;  %440 = vmatpush1.msra.mxu0 %v1035_v49  ;;  %v768_v22 = vpack.c.bf16 %v192_v8, %v180_v7  ;;  %v203_v27 = vsub.f32 %v1014_v38, %v202_v13  ;;  %v232_v29 = vand.u32 4294901760, %v1022_v43  ;;  %v226_v30 = vand.u32 4294901760, %v1029_v46 }
  0x3a   :  { %767 = vmatprep.subr.bf16.mxu1 %v766_v10  ;;  %803 = vmatprep.subr.bf16.mxu0 %v802_v3  ;;  %v162_v31 = vsub.f32 %v1063_v6, %v161_v14  ;;  %v770_v32 = vpack.c.bf16 %v210_v12, %v198_v11  ;;  %v215_v33 = vsub.f32 %v1016_v39, %v214_v20  ;;  %v238_v34 = vand.u32 4294901760, %v1045_v57 }
  0x3b   :  { %495 = vmatmul.mubr.f32.vlgmr.msra.gmra.mrb[0].mxu0 %v161_v14  ;;  %v204_v36 = vand.u32 4294901760, %v203_v27  ;;  %v808_v40 = vpack.c.bf16 %v214_v20, %v202_v13  ;;  %v221_v47 = vsub.f32 %v1020_v42, %v220_v21  ;;  %v233_v48 = vsub.f32 %v1022_v43, %v232_v29 }
  0x3c   :  { %v163_v50 = vand.u32 4294901760, %v162_v31  ;;  %805 = vmatpush1.bf16.msra.mxu0 %v804_v9  ;;  %v216_v51 = vand.u32 4294901760, %v215_v33  ;;  %v227_v52 = vsub.f32 %v1029_v46, %v226_v30  ;;  %v239_v53 = vsub.f32 %v1045_v57, %v238_v34  ;;  %607 = vmatprep.mubr.f32.mxu0 %v929_v0 }
  0x3d   :  { %807 = vmatprep.subr.bf16.mxu0 %v806_v15  ;;  %v222_v54 = vand.u32 4294901760, %v221_v47  ;;  %v234_v55 = vand.u32 4294901760, %v233_v48  ;;  %v810_v56 = vpack.c.bf16 %v232_v29, %v220_v21  ;;  %v243_v59 = vsub.f32 %v1008_v35, %v1025_v44 }
  0x3e   :  { %164 = vmatmul.mubr.f32.vlgmr.msra.gmra.mrb[0].mxu1 %v163_v50  ;;  %v772_v60 = vpack.c.bf16 %v216_v51, %v204_v36  ;;  %v228_v61 = vand.u32 4294901760, %v227_v52  ;;  %v240_v63 = vand.u32 4294901760, %v239_v53  ;;  %v250_v2 = vand.u32 4294901760, %v1048_v58 }
  0x3f   :  { %769 = vmatpush1.bf16.msra.mxu1 %v768_v22  ;;  %v244_v1 = vand.u32 4294901760, %v243_v59  ;;  %304 = vmatprep.mubr.f32.mxu1 %v929_v0  ;;  %v774_v3 = vpack.c.bf16 %v234_v55, %v222_v54  ;;  %v812_v4 = vpack.c.bf16 %v238_v34, %v226_v30  ;;  %v778_v10 = vpack.c.bf16 %v989_v18, %v987_v17 }
  0x40   :  { %771 = vmatprep.subr.bf16.mxu1 %v770_v32  ;;  %809 = vmatpush1.bf16.msra.mxu0 %v808_v40  ;;  %v776_v7 = vpack.c.bf16 %v240_v63, %v228_v61  ;;  %v251_v35 = vsub.f32 %v1048_v58, %v250_v2  ;;  %v780_v11 = vpack.c.bf16 %v995_v24, %v991_v19  ;;  %v57_v24 = vld [vmem:[%s1131_s2] sm:$0x3]  ;;  %v930_v13 = vmov 1966171168   ;;  %s931_s2 = smov [#allocation7]  }
  0x41   :  { %811 = vmatprep.subr.bf16.mxu0 %v810_v56  ;;  %v245_v5 = vsub.f32 %v243_v59, %v244_v1  ;;  %v782_v12 = vpack.c.bf16 %v1003_v28, %v999_v26  ;;  %v786_v17 = vpack.c.bf16 %v1022_v43, %v1020_v42  ;;  %v788_v18 = vpack.c.bf16 %v1045_v57, %v1029_v46  ;;  %s742_s12 = sshll.u32 %s931_s2, 4  ;;  %s743_s12 = int_to_ptr.vmem [resolvable:$true] %s742_s12 }
  0x42   :  { %v252_v9 = vand.u32 4294901760, %v251_v35  ;;  %v717_v14 = vunpack.c.l.s4 %v930_v13  ;;  %s897_s13 = scalar_lea.vmem %s743_s12, 32  ;;  %p902_p3 = scmp.lt.s32.totalorder %s743_s12, %s743_s12 }
  0x43   :  { %773 = vmatpush1.bf16.msra.mxu1 %v772_v60  ;;  %v246_v8 = vand.u32 4294901760, %v245_v5  ;;  %p898_p2 = scmp.ne.s32.totalorder %s743_s12, %s897_s13  ;;  %p903_p4 = scmp.lt.s32.totalorder %s897_s13, %s897_s13 }
  0x44   :  { %775 = vmatprep.subr.bf16.mxu1 %v774_v3  ;;  %813 = vmatpush1.bf16.msra.mxu0 %v812_v4  ;;  %v718_v15 = vunpack.c.0.s8 %v717_v14 }
  0x45   :  { %552 = vmatprep.subr.mxu0 %v244_v1  ;;  %p904_p5 = por %p903_p4, %p902_p3 }
  0x47   :  { %777 = vmatpush1.bf16.msra.mxu1 %v776_v7  ;;  %p905_p6 = pnand %p904_p5, %p898_p2 }
  0x48   :  { %247 = vmatprep.subr.mxu1 %v246_v8  ;;  %556 = vmatpush1.msra.mxu0 %v250_v2 }
  0x49   :  { %815 = vmatprep.subr.bf16.mxu0 %v985_v16  ;;  %609 = vmatmul.mubr.f32.vlgmr.msra.gmra.mrb[0].mxu0 %v1052_v62  ;;  %v784_v16 = vpack.c.bf16 %v1016_v39, %v1014_v38 }
  0x4a   :  { %817 = vmatpush1.bf16.msra.mxu0 %v993_v23  ;;  %693 = vmatprep.mubr.f32.mxu0 %v929_v0 }
  0x4b   :  { %253 = vmatpush1.msra.mxu1 %v252_v9  ;;  %819 = vmatprep.subr.bf16.mxu0 %v997_v25 }
  0x4c   :  { %779 = vmatprep.subr.bf16.mxu1 %v778_v10  ;;  %306 = vmatmul.mubr.f32.vlgmr.msra.gmra.mrb[0].mxu1 %v1052_v62 }
  0x4d   :  { %781 = vmatpush1.bf16.msra.mxu1 %v780_v11  ;;  %404 = vmatprep.mubr.f32.mxu1 %v929_v0  ;;  %v59_v0 = vlaneseq }
  0x4e   :  { %783 = vmatprep.subr.bf16.mxu1 %v782_v12  ;;  %821 = vmatpush1.bf16.msra.mxu0 %v1012_v37 }
  0x4f   :  { %823 = vmatprep.subr.bf16.mxu0 %v1018_v41  ;;  %v60_v19 = vshrl.u32 %v59_v0, 7  ;;  %vm733_vm2 = vcmp.lt.s32.totalorder %v59_v0, 216 }
  0x51   :  { %785 = vmatpush1.bf16.msra.mxu1 %v784_v16  ;;  %v61_v23 = vsub.s32 0, %v60_v19  ;;  %v65_v25 = vsub.s32 1, %v60_v19  ;;  %v721_v21 = vsub.s32 %v718_v15, %v60_v19 }
  0x52   :  { %787 = vmatprep.subr.bf16.mxu1 %v786_v17  ;;  %825 = vmatpush1.bf16.msra.mxu0 %v1027_v45 }
  0x53   :  { %640 = vmatprep.subr.mxu0 %v1025_v44  ;;  %v62_v26 = vrot.slane %v57_v24, %v61_v23  ;;  %v66_v37 = vrot.slane %v57_v24, %v65_v25 }
  0x55   :  { %789 = vmatpush1.bf16.msra.mxu1 %v788_v18 }
  0x56   :  { %350 = vmatprep.subr.mxu1 %v243_v59  ;;  %642 = vmatpush1.msra.mxu0 %v1035_v49 }
  0x57   :  { %695 = vmatmul.mubr.f32.vlgmr.msra.gmra.mrb[0].mxu0 %v1052_v62 }
  0x59   :  { %353 = vmatpush1.msra.mxu1 %v1048_v58 }
  0x5a   :  { %407 = vmatmul.mubr.f32.vlgmr.msra.gmra.mrb[0].mxu1 %v1063_v6 }
 0x12a   :  { %v696_v28 = vpop.f32.mrb[0].mxu0 }
 0x12b   :  { %v698_v38 = vpop.f32.mrb[1].mxu0 }
 0x12d   :  { %v408_v39 = vpop.f32.mrb[0].mxu1 }
 0x12e   :  { %v826_v41 = vadd.f32 %v408_v39, %v62_v26  ;;  %v410_v42 = vpop.f32.mrb[1].mxu1 }
 0x12f   :  { %v828_v43 = vadd.f32 %v410_v42, %v66_v37 }
 0x130   :  { %v827_v44 = vadd.f32 %v826_v41, %v696_v28 }
 0x131   :  { %v829_v45 = vadd.f32 %v828_v43, %v698_v38 }
 0x132   :  { %v752_v46 = vmul.f32 -1.442695, %v827_v44 }
 0x133   :  { %v753_v49 = vmul.f32 -1.442695, %v829_v45 }
 0x134   :  { %845 = vpow2.f32 %v752_v46 }
 0x135   :  { %847 = vpow2.f32 %v753_v49 }
 0x13e   :  { %v846_v57 = vpop.eup %845 }
 0x13f   :  { %v848_v58 = vpop.eup %847  ;;  %v707_v62 = vadd.f32 1.0, %v846_v57 }
 0x140   :  { %v708_v6 = vadd.f32 1.0, %v848_v58 }
 0x141   :  { %849 = vrcp.f32 %v707_v62 }
 0x142   :  { %851 = vrcp.f32 %v708_v6 }
 0x14b   :  { %v850_v20 = vpop.eup %849 }
 0x14c   :  { %v852_v22 = vpop.eup %851 }
 0x14d   :  { %v715_v27 = vcombine.low %v850_v20, %v852_v22 }
 0x14f   :  { %v722_v29 = vrot.slane %v715_v27, %v721_v21 }
 0x151   :  { %v729_v30 = vrot.slane %v722_v29, %v721_v21 }
 0x153   :  { %735 = vst.msk [vmem:[#allocation7] sm:$0x3] %vm733_vm2, %v729_v30 }
 0x154   :  { %908 = shalt.err (!%p905_p6)
}
 0x155   :  { %s909_s16 = scalar_lea.hbm %s1132_s3, 32 }
 0x156   :  { %p910_p7 = scmp.ne.s32.totalorder %s1132_s3, %s909_s16  ;;  %p913_p8 = scmp.lt.u32.totalorder %s909_s16, %s1132_s3 }
 0x158   :  { %p915_p9 = pnand %p913_p8, %p910_p7 }
 0x15a   :  { %918 = shalt.err (!%p915_p9)
}
 0x15b   :  { %745 = dma.vmem_to_hbm [thread:$0]  %s743_s12, 32, %s1132_s3, [#allocation4]  }
 0x15c   :  { %923 = dma.done.wait [#allocation4], 32  }
 0x15d   :  { %924 = vsyncadd [#allocation4], 4294967264 }
 0x15e   :  { %749 = vsyncpa [#allocation3], 1 }
 0x15f   :  { %750 = vsyncpa [#allocation6], 1 }
 0x160   :  { %751 = vsyncpa [#allocation4], 1 }

</bundles_post_ra>
